<compile_context>
chip_gen: v6e
topology: v6e:2x2x1
jax: 0.10.0
libtpu: 0.0.40
codegen_flags: <defaults>
</compile_context>

<pallas_src>
import jax
import jax.numpy as jnp
from jax import lax
from jax.experimental import pallas as pl
from jax.experimental.pallas import tpu as pltpu


def _deconv_taps_kernel_vpu(x_ref, w_ref, o_ref):
    """o[p, m] = sum_ci x[p, ci] * w[ci, m]  (per-pixel 1x1 'conv').

    Cin is tiny (e.g. 4), so the contraction is Cin VPU broadcast-FMAs instead of
    an MXU matmul: avoids MXU pipeline latency and wasted lanes, keeps the kernel
    bound only by the (lane-dense) output stores."""
    cin = x_ref.shape[2]
    acc = (x_ref[0, :, 0:1].astype(jnp.float32)
           * w_ref[0:1, :].astype(jnp.float32))
    for ci in range(1, cin):
        acc = acc + (x_ref[0, :, ci:ci + 1].astype(jnp.float32)
                     * w_ref[ci:ci + 1, :].astype(jnp.float32))
    o_ref[0, :, :] = acc


def _deconv_taps_kernel_mxu(x_ref, w_ref, o_ref):
    """Same contraction on the MXU -- used only when Cin is large enough."""
    o_ref[0, :, :] = jnp.dot(x_ref[0, :, :], w_ref[:, :],
                             preferred_element_type=jnp.float32)


def _pick_tile(n, cap, align):
    """Largest divisor of n that is <= cap and a multiple of `align`; else n."""
    if n <= cap:
        return n
    for d in range(cap, 0, -1):
        if n % d == 0 and d % align == 0:
            return d
    return n


def _deconv_taps_matmul(x3, w2):
    """x3: (B, P, Cin), w2: (Cin, M=Cout*K*K) -> (B, P, M) f32 tap contributions."""
    b, p, cin = x3.shape
    _, m = w2.shape
    # Lane-dense output tiles; tile M only when it is large (v7x: 64 MiB VMEM).
    mo_tile = _pick_tile(m, 2048, 128)
    pix_cap = max(8, (2 * 1024 * 1024) // (4 * mo_tile))   # ~2 MiB f32 out block
    pix_tile = _pick_tile(p, pix_cap, 8)
    kernel = _deconv_taps_kernel_vpu if cin <= 16 else _deconv_taps_kernel_mxu
    grid = (b, p // pix_tile, m // mo_tile)                 # (2, 1, 1) for the demo
    return pl.pallas_call(
        kernel,
        out_shape=jax.ShapeDtypeStruct((b, p, m), jnp.float32),
        grid_spec=pltpu.PrefetchScalarGridSpec(
            num_scalar_prefetch=0,
            grid=grid,
            in_specs=[
                pl.BlockSpec((1, pix_tile, cin), lambda bi, ri, mi: (bi, ri, 0)),
                pl.BlockSpec((cin, mo_tile), lambda bi, ri, mi: (0, mi)),
            ],
            out_specs=pl.BlockSpec((1, pix_tile, mo_tile),
                                   lambda bi, ri, mi: (bi, ri, mi)),
        ),
        compiler_params=pltpu.CompilerParams(
            # Every (b, row-tile, m-tile) block is independent -> all parallel;
            # >= 2 blocks so both v7x TensorCores are used.
            dimension_semantics=("parallel", "parallel", "parallel"),
            vmem_limit_bytes=32 * 1024 * 1024,
        ),
    )(x3, w2)


def deconv_layer_forward(x_nchw, weight, kernel_size, stride, padding,
                         compute_dtype=jnp.bfloat16):
    """Equivalent of nn.ConvTranspose2d(Cin, Cout, kernel_size, stride,
    bias=False, padding=padding)(x_nchw); weight layout (Cin, Cout, Kh, Kw)."""
    b, cin, h, w = x_nchw.shape
    cin_w, cout, kh_w, kw_w = weight.shape
    assert cin == cin_w and kh_w == kernel_size and kw_w == kernel_size
    s, p, k = stride, padding, kernel_size

    h_full = (h - 1) * s + k
    w_full = (w - 1) * s + k
    h_out = h_full - 2 * p
    w_out = w_full - 2 * p
    assert h_out > 0 and w_out > 0, "padding too large for this input size"

    w2 = weight.reshape(cin, cout * k * k).astype(compute_dtype)

    if s == k and p % k == 0:
        # FAST PATH (stride == kernel_size, crop aligned to taps): the tap
        # "scatter" is a pure depth-to-space permutation (no overlaps), and the
        # ConvTranspose2d `padding` crop maps to a crop of the INPUT -- so we
        # only compute the needed pixels and never touch an uncropped output.
        i0 = p // k
        h_sub, w_sub = h_out // k, w_out // k
        # TODO(synk): if activations can be kept NHWC upstream, this tiny
        # NCHW->NHWC transpose of the cropped input disappears entirely.
        x_c = x_nchw[:, :, i0:i0 + h_sub, i0:i0 + w_sub]
        x3 = (x_c.transpose(0, 2, 3, 1)
                 .reshape(b, h_sub * w_sub, cin).astype(compute_dtype))
        y = _deconv_taps_matmul(x3, w2)            # (B, h_sub*w_sub, Cout*K*K)
        # depth-to-space: (b, ih, iw, co, kh, kw) -> (b, co, ih, kh, iw, kw),
        # then adjacent-dim merges (free) give (B, Cout, h_out, w_out).
        return (y.reshape(b, h_sub, w_sub, cout, k, k)
                  .transpose(0, 3, 1, 4, 2, 5)
                  .reshape(b, cout, h_out, w_out))

    # GENERAL PATH (s != k or unaligned padding): per-pixel taps + placement.
    x3 = (x_nchw.transpose(0, 2, 3, 1)
                .reshape(b, h * w, cin).astype(compute_dtype))
    y = _deconv_taps_matmul(x3, w2)                # (B, H*W, Cout*K*K)
    y6 = y.reshape(b, h, w, cout, k, k)
    if s == k:
        out_full = (y6.transpose(0, 3, 1, 4, 2, 5)
                      .reshape(b, cout, h_full, w_full))
    else:
        # Overlapping taps: keep the scatter-add (only valid general form).
        out_full = jnp.zeros((b, cout, h_full, w_full), jnp.float32)
        for tkh in range(k):
            for tkw in range(k):
                contrib = y6[:, :, :, :, tkh, tkw].transpose(0, 3, 1, 2)
                out_full = out_full.at[:, :,
                                       tkh:tkh + (h - 1) * s + 1:s,
                                       tkw:tkw + (w - 1) * s + 1:s].add(contrib)
    return out_full[:, :, p:p + h_out, p:p + w_out]


if __name__ == "__main__":
    key = jax.random.PRNGKey(0)
    kx, kw_key = jax.random.split(key)

    # padding=16 is hardwired in DeconvLayer; (H=W=16, k=4, s=4) gives a valid
    # 32x32 output: (16-1)*4 + 4 - 2*16 = 32.
    B, Cin, H, W = 2, 4, 16, 16
    kernel_size, stride, Cout, padding = 4, 4, 8, 16

    x = jax.random.normal(kx, (B, Cin, H, W), jnp.float32)
    # TODO(synk): init_weights() is not defined in the reference snippet; use a
    # deterministic normal init with the correct ConvTranspose2d weight shape.
    weight = 0.1 * jax.random.normal(
        kw_key, (Cin, Cout, kernel_size, kernel_size), jnp.float32)

    @jax.jit
    def fwd(x_in, w_in):
        return deconv_layer_forward(x_in, w_in, kernel_size, stride, padding)

    out = jax.block_until_ready(fwd(x, weight))

    # Independent f32 reference: transposed conv == correlation of the
    # stride-dilated input with the flipped kernel, padding = k - 1 - p.
    w_flip = jnp.flip(weight, axis=(2, 3)).transpose(1, 0, 2, 3)  # (Cout,Cin,k,k)
    ref = lax.conv_general_dilated(
        x, w_flip, window_strides=(1, 1),
        padding=[(kernel_size - 1 - padding,) * 2] * 2,
        lhs_dilation=(stride, stride),
        dimension_numbers=("NCHW", "OIHW", "NCHW"))

    assert out.shape == ref.shape == (B, Cout, 32, 32), (out.shape, ref.shape)
    # bf16 kernel inputs with f32 accumulation vs. an f32 reference -> loosened
    # tolerance (per review); observed error is ~1e-3-scale, bound is 3e-2.
    max_err = float(jnp.max(jnp.abs(out - ref)))
    assert jnp.allclose(out, ref, atol=3e-2, rtol=3e-2), max_err
    print("KERNEL_OK")
</pallas_src>

<mosaic_0001>
module attributes {stable_mosaic.version = 11 : i64} {
  func.func @_deconv_taps_kernel_vpu(%arg0: i32, %arg1: i32, %arg2: i32, %arg3: memref<1x64x4xbf16, #tpu.memory_space<vmem>>, %arg4: memref<4x128xbf16, #tpu.memory_space<vmem>>, %arg5: memref<1x64x128xf32, #tpu.memory_space<vmem>>) attributes {dimension_semantics = [#tpu.dimension_semantics<parallel>, #tpu.dimension_semantics<parallel>, #tpu.dimension_semantics<parallel>], iteration_bounds = array<i64: 2, 1, 1>, scalar_prefetch = 0 : i64, scratch_operands = 0 : i64, tpu.core_type = #tpu.core_type<tc>, window_params = [{transform_indices = @transform_0, window_bounds = array<i64: 1, 64, 4>}, {transform_indices = @transform_1, window_bounds = array<i64: 4, 128>}, {transform_indices = @transform_2, window_bounds = array<i64: 1, 64, 128>}]} {
    %c0 = arith.constant 0 : index
    %c0_0 = arith.constant 0 : index
    %c0_1 = arith.constant 0 : index
    %0 = vector.load %arg3[%c0, %c0_0, %c0_1] : memref<1x64x4xbf16, #tpu.memory_space<vmem>>, vector<1x64x1xbf16>
    %1 = vector.shape_cast %0 : vector<1x64x1xbf16> to vector<64x1xbf16>
    %2 = arith.extf %1 : vector<64x1xbf16> to vector<64x1xf32>
    %c0_2 = arith.constant 0 : index
    %c0_3 = arith.constant 0 : index
    %3 = vector.load %arg4[%c0_2, %c0_3] : memref<4x128xbf16, #tpu.memory_space<vmem>>, vector<1x128xbf16>
    %4 = arith.extf %3 : vector<1x128xbf16> to vector<1x128xf32>
    %5 = vector.broadcast %2 : vector<64x1xf32> to vector<64x128xf32>
    %6 = vector.broadcast %4 : vector<1x128xf32> to vector<64x128xf32>
    %7 = arith.mulf %5, %6 : vector<64x128xf32>
    %c0_4 = arith.constant 0 : index
    %c0_5 = arith.constant 0 : index
    %c1 = arith.constant 1 : index
    %8 = vector.load %arg3[%c0_4, %c0_5, %c1] : memref<1x64x4xbf16, #tpu.memory_space<vmem>>, vector<1x64x1xbf16>
    %9 = vector.shape_cast %8 : vector<1x64x1xbf16> to vector<64x1xbf16>
    %10 = arith.extf %9 : vector<64x1xbf16> to vector<64x1xf32>
    %c1_6 = arith.constant 1 : index
    %c0_7 = arith.constant 0 : index
    %11 = vector.load %arg4[%c1_6, %c0_7] : memref<4x128xbf16, #tpu.memory_space<vmem>>, vector<1x128xbf16>
    %12 = arith.extf %11 : vector<1x128xbf16> to vector<1x128xf32>
    %13 = vector.broadcast %10 : vector<64x1xf32> to vector<64x128xf32>
    %14 = vector.broadcast %12 : vector<1x128xf32> to vector<64x128xf32>
    %15 = arith.mulf %13, %14 : vector<64x128xf32>
    %16 = arith.addf %7, %15 : vector<64x128xf32>
    %c0_8 = arith.constant 0 : index
    %c0_9 = arith.constant 0 : index
    %c2 = arith.constant 2 : index
    %17 = vector.load %arg3[%c0_8, %c0_9, %c2] : memref<1x64x4xbf16, #tpu.memory_space<vmem>>, vector<1x64x1xbf16>
    %18 = vector.shape_cast %17 : vector<1x64x1xbf16> to vector<64x1xbf16>
    %19 = arith.extf %18 : vector<64x1xbf16> to vector<64x1xf32>
    %c2_10 = arith.constant 2 : index
    %c0_11 = arith.constant 0 : index
    %20 = vector.load %arg4[%c2_10, %c0_11] : memref<4x128xbf16, #tpu.memory_space<vmem>>, vector<1x128xbf16>
    %21 = arith.extf %20 : vector<1x128xbf16> to vector<1x128xf32>
    %22 = vector.broadcast %19 : vector<64x1xf32> to vector<64x128xf32>
    %23 = vector.broadcast %21 : vector<1x128xf32> to vector<64x128xf32>
    %24 = arith.mulf %22, %23 : vector<64x128xf32>
    %25 = arith.addf %16, %24 : vector<64x128xf32>
    %c0_12 = arith.constant 0 : index
    %c0_13 = arith.constant 0 : index
    %c3 = arith.constant 3 : index
    %26 = vector.load %arg3[%c0_12, %c0_13, %c3] : memref<1x64x4xbf16, #tpu.memory_space<vmem>>, vector<1x64x1xbf16>
    %27 = vector.shape_cast %26 : vector<1x64x1xbf16> to vector<64x1xbf16>
    %28 = arith.extf %27 : vector<64x1xbf16> to vector<64x1xf32>
    %c3_14 = arith.constant 3 : index
    %c0_15 = arith.constant 0 : index
    %29 = vector.load %arg4[%c3_14, %c0_15] : memref<4x128xbf16, #tpu.memory_space<vmem>>, vector<1x128xbf16>
    %30 = arith.extf %29 : vector<1x128xbf16> to vector<1x128xf32>
    %31 = vector.broadcast %28 : vector<64x1xf32> to vector<64x128xf32>
    %32 = vector.broadcast %30 : vector<1x128xf32> to vector<64x128xf32>
    %33 = arith.mulf %31, %32 : vector<64x128xf32>
    %34 = arith.addf %25, %33 : vector<64x128xf32>
    %c0_16 = arith.constant 0 : index
    %c0_17 = arith.constant 0 : index
    %c0_18 = arith.constant 0 : index
    %35 = vector.load %arg5[%c0_16, %c0_17, %c0_18] : memref<1x64x128xf32, #tpu.memory_space<vmem>>, vector<1x64x128xf32>
    %36 = vector.shape_cast %35 : vector<1x64x128xf32> to vector<64x128xf32>
    %37 = vector.shape_cast %34 : vector<64x128xf32> to vector<1x64x128xf32>
    tpu.vector_store %arg5[%c0_16, %c0_17, %c0_18], %37 {strides = array<i32>} : memref<1x64x128xf32, #tpu.memory_space<vmem>>, vector<1x64x128xf32>,
    return
  }
  func.func @transform_0(%arg0: i32, %arg1: i32, %arg2: i32) -> (i32, i32, i32) {
    %c0_i32 = arith.constant 0 : i32
    %c0_i32_0 = arith.constant 0 : i32
    return %arg0, %arg1, %c0_i32 : i32, i32, i32
  }
  func.func @transform_1(%arg0: i32, %arg1: i32, %arg2: i32) -> (i32, i32) {
    %c0_i32 = arith.constant 0 : i32
    %c0_i32_0 = arith.constant 0 : i32
    return %c0_i32, %arg2 : i32, i32
  }
  func.func @transform_2(%arg0: i32, %arg1: i32, %arg2: i32) -> (i32, i32, i32) {
    %c0_i32 = arith.constant 0 : i32
    return %arg0, %arg1, %arg2 : i32, i32, i32
  }
}

</mosaic_0001>

<bundles_post_ra>
// kernel: fwd.1
= control target key start
LH: loop header
LB: loop body
LE: loop exit
PB: predicated region body
PF: predicated region fallthrough
CT: control target
= control target key end

     0   :  { %s758_s9 = smov 0   ;;  %s760_s10 = smov 0   ;;  %s851_s0 = inlined_call_operand.vmem [shape: bf16[2,64,4], index: 0, kind: input, shape index: {}]   ;;  %s852_s1 = inlined_call_operand.vmem [shape: bf16[4,128], index: 1, kind: input, shape index: {}]   ;;  %s853_s2 = inlined_call_operand.vmem [shape: f32[2,64,128], index: 2, kind: output, shape index: {}]  }
   0x1   :  { %s762_s11 = smov 0  }
   0x2 LB: > { %s31_s12 = sadd.s32 1, %s733_s10  ;;  %p571_p0 = scmp.ge.s32.totalorder %s737_s11, 1  ;;  %s737_s11 = sphi %s762_s11, %s12_s11   ;;  %s733_s10 = sphi %s760_s10, %s855_s10   ;;  %s729_s9 = sphi %s758_s9, %s854_s9  }
   0x3   : > { %p33_p1 = scmp.ge.s32.totalorder %s31_s12, 2  ;;  %p151_p2 = scmp.lt.s32.totalorder %s737_s11, 3 }
   0x5   : > { %s857_s12 = smov (%p33_p1, %s31_s12), 0  ;;  %p152_p3 = pnand %p571_p0, %p151_p2 }
   0x6   : > { %p189_p4 = scmp.lt.s32.totalorder (!%p152_p3), %s729_s9, 1 }
   0x7   : > { %155 = sbr.rel (%p152_p3) target bundleno = 186 (0xba), region = 28 }
   0xc   : > { %v739_v0 = vmov 0   ;;  %s859_s9 = smov (!%p189_p4, %s729_s9), 1  ;;  %v740_v17 = vmov 1   ;;  %v741_v18 = vmov 2   ;;  %v742_v19 = vmov 3  }
   0xd   : > { %638 = vset.pattern.permute.xlu1 %v739_v0  ;;  %627 = vset.pattern.permute.xlu0 %v739_v0  ;;  %s578_s13 = sshll.u32 %s859_s9, 5  ;;  %v273_v22 = vlaneseq  ;;  %v231_v26 = vld [vmem:[%s852_s1] sm:$0x1]  ;;  %v337_v29 = vld [vmem:[%s852_s1] sm:$0x2]  ;;  %s579_s21 = sshll.u32 %s859_s9, 6 }
   0xe   : > { %s196_s16 = scalar_lea.vmem %s851_s0, %s578_s13  ;;  %v232_v30 = vunpack.c.l.bf16 %v231_v26  ;;  %v338_v33 = vunpack.c.l.bf16 %v337_v29  ;;  %s818_s24 = scalar_lea.vmem %s853_s2, %s579_s21 }
   0xf   : > { %v597_v1 = vld [vmem:[%s196_s16 + $0x10] sm:$0xff]   ;;  %v581_v2 = vld [vmem:[%s196_s16] sm:$0xff]   ;;  %v598_v3 = vld [vmem:[%s196_s16 + $0x18] sm:$0xff]   ;;  %v274_v25 = vshrl.u32 %v273_v22, 7 }
  0x10   : > { %v590_v4 = vunpack.c.l.bf16 %v597_v1  ;;  %v591_v5 = vunpack.c.h.bf16 %v597_v1  ;;  %v582_v6 = vunpack.c.l.bf16 %v581_v2  ;;  %v583_v7 = vunpack.c.h.bf16 %v581_v2  ;;  %v596_v8 = vld [vmem:[%s196_s16 + $0x8] sm:$0xff]  }
  0x11   : > { %v594_v9 = vunpack.c.l.bf16 %v598_v3  ;;  %v595_v10 = vunpack.c.h.bf16 %v598_v3  ;;  %v586_v11 = vunpack.c.l.bf16 %v596_v8  ;;  %v587_v12 = vunpack.c.h.bf16 %v596_v8 }
  0x12   : > { %v639_v13 = vpack.i.bf16 %v591_v5, %v590_v4  ;;  %v628_v14 = vpack.i.bf16 %v583_v7, %v582_v6  ;;  %v275_v31 = vsub.s32 0, %v274_v25  ;;  %v319_v32 = vsub.s32 1, %v274_v25 }
  0x13   : > { %v644_v15 = vpack.i.bf16 %v595_v10, %v594_v9  ;;  %v633_v16 = vpack.i.bf16 %v587_v12, %v586_v11  ;;  %v373_v34 = vsub.s32 2, %v274_v25  ;;  %v425_v35 = vsub.s32 3, %v274_v25 }
  0x14   : > { %640 = vperm.xlu1 %638, %v639_v13   ;;  %629 = vperm.xlu0 %627, %v628_v14   ;;  %v276_v40 = vrot.slane %v232_v30, %v275_v31  ;;  %v790_v41 = vrot.slane %v232_v30, %v319_v32 }
  0x15   : > { %v792_v44 = vrot.slane %v338_v33, %v373_v34  ;;  %v794_v45 = vrot.slane %v338_v33, %v425_v35 }
  0x18   : > { %645 = vperm.xlu1 %638, %v644_v15   ;;  %634 = vperm.xlu0 %627, %v633_v16  }
  0x1c   : > { %655 = vset.pattern.permute.xlu1 %v740_v17  ;;  %649 = vset.pattern.permute.xlu0 %v740_v17 }
  0x1d   : > { %657 = vperm.xlu1 %655, %v633_v16   ;;  %651 = vperm.xlu0 %649, %v628_v14  }
  0x21   : > { %662 = vperm.xlu1 %655, %v639_v13   ;;  %667 = vperm.xlu0 %649, %v644_v15  }
  0x25   : > { %671 = vset.pattern.permute.xlu1 %v741_v18  ;;  %677 = vset.pattern.permute.xlu0 %v741_v18 }
  0x26   : > { %673 = vperm.xlu1 %671, %v628_v14   ;;  %679 = vperm.xlu0 %677, %v633_v16  }
  0x2a   : > { %684 = vperm.xlu1 %671, %v639_v13   ;;  %693 = vset.pattern.permute.xlu0 %v742_v19 }
  0x2b   : > { %695 = vperm.xlu0 %693, %v628_v14  }
  0x2e   : > { %689 = vperm.xlu1 %671, %v644_v15  }
  0x2f   : > { %711 = vperm.xlu0 %693, %v644_v15  }
  0x32   : > { %699 = vset.pattern.permute.xlu1 %v742_v19 }
  0x33   : > { %701 = vperm.xlu1 %699, %v633_v16  }
  0x37   : > { %706 = vperm.xlu1 %699, %v639_v13  }
  0x8f   : > { %v641_v20 = vpop.permute.xlu1 %640  ;;  %v630_v21 = vpop.permute.xlu0 %629 }
  0x90   : > { %v632_v38 = vunpack.i.h.bf16 %v630_v21  ;;  %v631_v39 = vunpack.i.l.bf16 %v630_v21  ;;  %v643_v46 = vunpack.i.h.bf16 %v641_v20  ;;  %v642_v47 = vunpack.i.l.bf16 %v641_v20 }
  0x92   : > { %v278_v50 = vmul.f32 %v632_v38, %v276_v40  ;;  %v277_v51 = vmul.f32 %v631_v39, %v276_v40  ;;  %v798_v0 = vmul.f32 %v643_v46, %v276_v40  ;;  %v800_v1 = vmul.f32 %v642_v47, %v276_v40 }
  0x93   : > { %v646_v23 = vpop.permute.xlu1 %645  ;;  %v635_v24 = vpop.permute.xlu0 %634 }
  0x94   : > { %v648_v48 = vunpack.i.h.bf16 %v646_v23  ;;  %v647_v49 = vunpack.i.l.bf16 %v646_v23  ;;  %v637_v56 = vunpack.i.h.bf16 %v635_v24  ;;  %v636_v57 = vunpack.i.l.bf16 %v635_v24 }
  0x96   : > { %v284_v2 = vmul.f32 %v648_v48, %v276_v40  ;;  %v283_v3 = vmul.f32 %v647_v49, %v276_v40  ;;  %v280_v9 = vmul.f32 %v637_v56, %v276_v40  ;;  %v279_v10 = vmul.f32 %v636_v57, %v276_v40 }
  0x98   : > { %v658_v27 = vpop.permute.xlu1 %657  ;;  %v652_v28 = vpop.permute.xlu0 %651 }
  0x99   : > { %v654_v42 = vunpack.i.h.bf16 %v652_v28  ;;  %v653_v43 = vunpack.i.l.bf16 %v652_v28  ;;  %v660_v58 = vunpack.i.h.bf16 %v658_v27  ;;  %v659_v59 = vunpack.i.l.bf16 %v658_v27 }
  0x9b   : > { %v322_v60 = vmul.f32 %v654_v42, %v790_v41  ;;  %v321_v61 = vmul.f32 %v653_v43, %v790_v41  ;;  %v324_v14 = vmul.f32 %v660_v58, %v790_v41  ;;  %v323_v15 = vmul.f32 %v659_v59, %v790_v41 }
  0x9c   : > { %v788_v36 = vpop.permute.xlu1 %662  ;;  %v668_v37 = vpop.permute.xlu0 %667 }
  0x9d   : > { %v670_v52 = vunpack.i.h.bf16 %v668_v37  ;;  %v669_v53 = vunpack.i.l.bf16 %v668_v37  ;;  %v329_v16 = vadd.f32 %v321_v61, %v277_v51  ;;  %v330_v17 = vadd.f32 %v322_v60, %v278_v50 }
  0x9e   : > { %v665_v18 = vunpack.i.h.bf16 %v788_v36  ;;  %v664_v19 = vunpack.i.l.bf16 %v788_v36  ;;  %v331_v47 = vadd.f32 %v323_v15, %v279_v10  ;;  %v332_v48 = vadd.f32 %v324_v14, %v280_v9 }
  0x9f   : > { %v328_v4 = vmul.f32 %v670_v52, %v790_v41  ;;  %v327_v5 = vmul.f32 %v669_v53, %v790_v41 }
  0xa0   : > { %v326_v49 = vmul.f32 %v665_v18, %v790_v41  ;;  %v325_v50 = vmul.f32 %v664_v19, %v790_v41 }
  0xa1   : > { %v674_v54 = vpop.permute.xlu1 %673  ;;  %v680_v55 = vpop.permute.xlu0 %679  ;;  %v336_v22 = vadd.f32 %v328_v4, %v284_v2  ;;  %v335_v23 = vadd.f32 %v327_v5, %v283_v3 }
  0xa2   : > { %v676_v62 = vunpack.i.h.bf16 %v674_v54  ;;  %v675_v63 = vunpack.i.l.bf16 %v674_v54  ;;  %v682_v6 = vunpack.i.h.bf16 %v680_v55  ;;  %v681_v7 = vunpack.i.l.bf16 %v680_v55 }
  0xa3   : > { %v333_v2 = vadd.f32 %v325_v50, %v800_v1 }
  0xa4   : > { %v376_v11 = vmul.f32 %v676_v62, %v792_v44  ;;  %v375_v12 = vmul.f32 %v675_v63, %v792_v44  ;;  %v378_v24 = vmul.f32 %v682_v6, %v792_v44  ;;  %v377_v25 = vmul.f32 %v681_v7, %v792_v44 }
  0xa5   : > { %v685_v8 = vpop.permute.xlu1 %684  ;;  %v334_v63 = vadd.f32 %v326_v49, %v798_v0 }
  0xa6   : > { %v696_v13 = vpop.permute.xlu0 %695  ;;  %v383_v27 = vadd.f32 %v375_v12, %v329_v16  ;;  %v384_v28 = vadd.f32 %v376_v11, %v330_v17  ;;  %v687_v36 = vunpack.i.h.bf16 %v685_v8  ;;  %v686_v37 = vunpack.i.l.bf16 %v685_v8 }
  0xa7   : > { %v698_v20 = vunpack.i.h.bf16 %v696_v13  ;;  %v697_v21 = vunpack.i.l.bf16 %v696_v13  ;;  %v385_v56 = vadd.f32 %v377_v25, %v331_v47  ;;  %v386_v57 = vadd.f32 %v378_v24, %v332_v48 }
  0xa8   : > { %v380_v58 = vmul.f32 %v687_v36, %v792_v44  ;;  %v379_v59 = vmul.f32 %v686_v37, %v792_v44 }
  0xa9   : > { %v690_v26 = vpop.permute.xlu1 %689  ;;  %v428_v29 = vmul.f32 %v698_v20, %v794_v45  ;;  %v427_v30 = vmul.f32 %v697_v21, %v794_v45 }
  0xaa   : > { %v712_v31 = vpop.permute.xlu0 %711  ;;  %v692_v32 = vunpack.i.h.bf16 %v690_v26  ;;  %v691_v33 = vunpack.i.l.bf16 %v690_v26  ;;  %v388_v7 = vadd.f32 %v380_v58, %v334_v63  ;;  %v387_v8 = vadd.f32 %v379_v59, %v333_v2 }
  0xab   : > { %v714_v34 = vunpack.i.h.bf16 %v712_v31  ;;  %v713_v35 = vunpack.i.l.bf16 %v712_v31  ;;  %v435_v38 = vadd.f32 %v427_v30, %v383_v27  ;;  %v436_v39 = vadd.f32 %v428_v29, %v384_v28 }
  0xac   : > { %v382_v40 = vmul.f32 %v692_v32, %v792_v44  ;;  %v381_v42 = vmul.f32 %v691_v33, %v792_v44 }
  0xad   : > { %v434_v43 = vmul.f32 %v714_v34, %v794_v45  ;;  %v433_v46 = vmul.f32 %v713_v35, %v794_v45  ;;  %443 = vst [vmem:[%s818_s24] sm:$0xff] %v435_v38  ;;  %444 = vst [vmem:[%s818_s24 + $0x8] sm:$0xff] %v436_v39 }
  0xae   : > { %v702_v51 = vpop.permute.xlu1 %701  ;;  %v389_v52 = vadd.f32 %v381_v42, %v335_v23  ;;  %v390_v53 = vadd.f32 %v382_v40, %v336_v22 }
  0xaf   : > { %v704_v54 = vunpack.i.h.bf16 %v702_v51  ;;  %v703_v55 = vunpack.i.l.bf16 %v702_v51 }
  0xb0   : > { %v441_v60 = vadd.f32 %v433_v46, %v389_v52  ;;  %v442_v61 = vadd.f32 %v434_v43, %v390_v53 }
  0xb1   : > { %v430_v41 = vmul.f32 %v704_v54, %v794_v45  ;;  %v429_v62 = vmul.f32 %v703_v55, %v794_v45 }
  0xb2   : > { %v707_v3 = vpop.permute.xlu1 %706  ;;  %449 = vst [vmem:[%s818_s24 + $0x30] sm:$0xff] %v441_v60  ;;  %450 = vst [vmem:[%s818_s24 + $0x38] sm:$0xff] %v442_v61 }
  0xb3   : > { %v437_v4 = vadd.f32 %v429_v62, %v385_v56  ;;  %v438_v5 = vadd.f32 %v430_v41, %v386_v57  ;;  %v709_v44 = vunpack.i.h.bf16 %v707_v3  ;;  %v708_v6 = vunpack.i.l.bf16 %v707_v3 }
  0xb5   : > { %445 = vst [vmem:[%s818_s24 + $0x10] sm:$0xff] %v437_v4  ;;  %446 = vst [vmem:[%s818_s24 + $0x18] sm:$0xff] %v438_v5  ;;  %v432_v9 = vmul.f32 %v709_v44, %v794_v45  ;;  %v431_v10 = vmul.f32 %v708_v6, %v794_v45 }
  0xb7   : > { %v439_v0 = vadd.f32 %v431_v10, %v387_v8  ;;  %v440_v11 = vadd.f32 %v432_v9, %v388_v7 }
  0xb9   : > { %447 = vst [vmem:[%s818_s24 + $0x20] sm:$0xff] %v439_v0  ;;  %448 = vst [vmem:[%s818_s24 + $0x28] sm:$0xff] %v440_v11 }
  0xba PF: > { %s12_s11 = sadd.s32 1, %s737_s11   ;;  %s854_s9 = smov %s733_s10 }
  0xbb   : > { %p9_p5 = scmp.ge.s32.totalorder %s12_s11, 4   ;;  %s855_s10 = smov %s857_s12 }
  0xbd   :  { %11 = sbr.rel (!%p9_p5) target bundleno = 2 (0x2), region = 61 }

</bundles_post_ra>
